<compile_context>
chip_gen: v5e
topology: v5e:2x2
jax: 0.10.0
libtpu: 0.0.40
codegen_flags: <defaults>
</compile_context>

<pallas_src>
import functools

import jax
import jax.numpy as jnp
from jax.experimental import pallas as pl
from jax.experimental.pallas import tpu as pltpu

LN_EPS = 1e-5  # PyTorch nn.LayerNorm default


def _blockwise_embed_kernel(x_ref, w_ref, b_ref,
                            g1_ref, be1_ref, g2_ref, be2_ref,
                            o_ref, *, d_true):
    # x_ref : (B_tile, N, P)      patch tile for block g (g dim squeezed out)
    # w_ref : (P, D_pad)          per-block linear weight (bf16 or f32), y = x @ w
    # b_ref : (1, D_pad)          per-block linear bias (f32, zero in padded lanes)
    # g1/be1: (1, P)              pre_norm gamma/beta
    # g2/be2: (1, D_pad)          post_norm gamma/beta (zero in padded lanes)
    # o_ref : (B_tile, N, D_pad)  output tile
    bt, n, p = x_ref.shape
    d_pad = o_ref.shape[-1]

    # Fold batch*patches into the matmul M dimension.
    x = x_ref[...].reshape(bt * n, p).astype(jnp.float32)          # (M, P)

    # ---- pre LayerNorm over patch_dim (f32) ----
    mean = jnp.mean(x, axis=-1, keepdims=True)
    xc = x - mean
    var = jnp.mean(xc * xc, axis=-1, keepdims=True)
    xn = xc * jax.lax.rsqrt(var + LN_EPS)                           # rsqrt -> EUP slot
    xn = xn * g1_ref[...] + be1_ref[...]                            # (M, P)

    # ---- per-block linear projection: one big MXU matmul ----
    y = jnp.dot(xn.astype(w_ref.dtype), w_ref[...],
                preferred_element_type=jnp.float32)                 # (M, D_pad), f32 acc
    y = y + b_ref[...].astype(jnp.float32)

    # ---- post LayerNorm over the TRUE transformer_dim (padded lanes are exact zeros) ----
    inv_d = 1.0 / d_true
    mean2 = jnp.sum(y, axis=-1, keepdims=True) * inv_d
    yc = y - mean2
    if d_pad != d_true:
        lane = jax.lax.broadcasted_iota(jnp.int32, (1, d_pad), 1)
        yc = yc * (lane < d_true).astype(jnp.float32)               # mask pad out of var
    var2 = jnp.sum(yc * yc, axis=-1, keepdims=True) * inv_d
    yn = yc * jax.lax.rsqrt(var2 + LN_EPS) * g2_ref[...] + be2_ref[...]

    o_ref[...] = yn.reshape(bt, n, d_pad).astype(o_ref.dtype)


def _round_up(x, m):
    return (x + m - 1) // m * m


def _pick_b_tile(B, N, P, D_pad, *, max_rows=1024, vmem_budget_bytes=12 * 1024 * 1024):
    """Largest divisor of B such that the fused M=B_tile*N tile fits the VMEM budget."""
    best = 1
    for bt in range(1, B + 1):
        if B % bt:
            continue
        rows = bt * N
        buf_bytes = 2 * rows * (P + D_pad) * 4   # double-buffered in+out tiles (f32 bound)
        if rows <= max_rows and buf_bytes <= vmem_budget_bytes:
            best = bt
    return best


def blockwise_patch_embedding(x, params, *, patch_depth, patch_height, patch_width,
                              use_bf16_matmul=True):
    """x: (B, C, H, W)  ->  (B, num_blocks * num_patches, transformer_dim)."""
    B, C, H, W = x.shape
    p0, p1, p2 = patch_depth, patch_height, patch_width
    assert C % p0 == 0 and H % p1 == 0 and W % p2 == 0
    G = C // p0
    h, w = H // p1, W // p2
    N = h * w
    P = p0 * p1 * p2
    D = params["w"].shape[-1]
    D_pad = _round_up(D, 128)

    # Rearrange 'b (c p0) (h p1) (w p2) -> b c (h w) (p0 p1 p2)' (host-side glue).
    patches = x.reshape(B, G, p0, h, p1, w, p2)
    patches = patches.transpose(0, 1, 3, 5, 2, 4, 6)
    patches = patches.reshape(B, G, N, P)

    # Parameter prep: zero-pad D to a lane-dense multiple of 128.
    w_p = params["w"]                                   # (G, P, D)
    b_p = params["b"].reshape(G, 1, D)
    g1 = params["pre_gamma"].reshape(1, P)
    be1 = params["pre_beta"].reshape(1, P)
    g2 = params["post_gamma"].reshape(1, D)
    be2 = params["post_beta"].reshape(1, D)
    if D_pad != D:
        pad = D_pad - D
        w_p = jnp.pad(w_p, ((0, 0), (0, 0), (0, pad)))
        b_p = jnp.pad(b_p, ((0, 0), (0, 0), (0, pad)))
        g2 = jnp.pad(g2, ((0, 0), (0, pad)))
        be2 = jnp.pad(be2, ((0, 0), (0, pad)))
    if use_bf16_matmul:
        w_p = w_p.astype(jnp.bfloat16)                  # halves weight DMA, MXU-native

    B_tile = _pick_b_tile(B, N, P, D_pad)
    nb = B // B_tile
    grid = (G, nb)                                      # G outermost -> weight stays VMEM-resident

    kernel = functools.partial(_blockwise_embed_kernel, d_true=D)

    out = pl.pallas_call(
        kernel,
        out_shape=jax.ShapeDtypeStruct((B, G, N, D_pad), x.dtype),
        grid_spec=pltpu.PrefetchScalarGridSpec(
            num_scalar_prefetch=0,
            grid=grid,
            in_specs=[
                pl.BlockSpec((B_tile, None, N, P), lambda g, bt: (bt, g, 0, 0)),   # patches
                pl.BlockSpec((None, P, D_pad), lambda g, bt: (g, 0, 0)),           # weight
                pl.BlockSpec((None, 1, D_pad), lambda g, bt: (g, 0, 0)),           # bias
                pl.BlockSpec((1, P), lambda g, bt: (0, 0)),                        # pre gamma
                pl.BlockSpec((1, P), lambda g, bt: (0, 0)),                        # pre beta
                pl.BlockSpec((1, D_pad), lambda g, bt: (0, 0)),                    # post gamma
                pl.BlockSpec((1, D_pad), lambda g, bt: (0, 0)),                    # post beta
            ],
            out_specs=pl.BlockSpec((B_tile, None, N, D_pad),
                                   lambda g, bt: (bt, g, 0, 0)),
        ),
        compiler_params=pltpu.CompilerParams(
            dimension_semantics=("parallel", "parallel"),
            vmem_limit_bytes=32 * 1024 * 1024),
    )(patches, w_p, b_p, g1, be1, g2, be2)

    if D_pad != D:
        out = out[..., :D]
    # 'b g n d -> b (g n) d'
    return out.reshape(B, G * N, D)


def init_params(key, num_channels, transformer_dim, patch_depth, patch_height, patch_width):
    G = num_channels // patch_depth
    P = patch_depth * patch_height * patch_width
    D = transformer_dim
    kw, kb = jax.random.split(key)
    bound = 1.0 / (P ** 0.5)  # PyTorch nn.Linear default init range
    # store weights as (G, P, D) = W.T per block, so y = x @ w + b
    w = jax.random.uniform(kw, (G, P, D), jnp.float32, -bound, bound)
    b = jax.random.uniform(kb, (G, 1, D), jnp.float32, -bound, bound)
    return {
        "w": w,
        "b": b,
        "pre_gamma": jnp.ones((1, P), jnp.float32),
        "pre_beta": jnp.zeros((1, P), jnp.float32),
        "post_gamma": jnp.ones((1, D), jnp.float32),
        "post_beta": jnp.zeros((1, D), jnp.float32),
    }


def _reference(x, params, *, patch_depth, patch_height, patch_width):
    """Pure-JAX f32 reference matching the PyTorch module."""
    B, C, H, W = x.shape
    p0, p1, p2 = patch_depth, patch_height, patch_width
    G = C // p0
    h, w = H // p1, W // p2
    N, P = h * w, p0 * p1 * p2
    D = params["w"].shape[-1]
    patches = x.reshape(B, G, p0, h, p1, w, p2).transpose(0, 1, 3, 5, 2, 4, 6).reshape(B, G, N, P)
    m = patches.mean(-1, keepdims=True)
    v = ((patches - m) ** 2).mean(-1, keepdims=True)
    xn = (patches - m) / jnp.sqrt(v + LN_EPS)
    xn = xn * params["pre_gamma"].reshape(1, 1, 1, P) + params["pre_beta"].reshape(1, 1, 1, P)
    y = jnp.einsum("bgnp,gpd->bgnd", xn, params["w"]) + params["b"].reshape(1, G, 1, D)
    m2 = y.mean(-1, keepdims=True)
    v2 = ((y - m2) ** 2).mean(-1, keepdims=True)
    yn = (y - m2) / jnp.sqrt(v2 + LN_EPS)
    yn = yn * params["post_gamma"].reshape(1, 1, 1, D) + params["post_beta"].reshape(1, 1, 1, D)
    return yn.reshape(B, G * N, D)


if __name__ == "__main__":
    # small config: num_channels=4, patch_depth=2 -> num_blocks=2
    # H=W=16, patch_height=patch_width=4 -> 16 patches per block, patch_dim=32
    num_channels, transformer_dim = 4, 32
    patch_depth, patch_height, patch_width = 2, 4, 4
    B, H, W = 2, 16, 16

    key = jax.random.PRNGKey(0)
    kx, kp = jax.random.split(key)
    x = jax.random.normal(kx, (B, num_channels, H, W), jnp.float32)
    params = init_params(kp, num_channels, transformer_dim,
                         patch_depth, patch_height, patch_width)

    out = blockwise_patch_embedding(
        x, params,
        patch_depth=patch_depth,
        patch_height=patch_height,
        patch_width=patch_width)
    jax.block_until_ready(out)

    G = num_channels // patch_depth
    N = (H // patch_height) * (W // patch_width)
    assert out.shape == (B, G * N, transformer_dim), out.shape

    ref = _reference(x, params, patch_depth=patch_depth,
                     patch_height=patch_height, patch_width=patch_width)
    err = float(jnp.max(jnp.abs(out.astype(jnp.float32) - ref)))
    assert err < 5e-2, f"max abs error {err}"  # bf16 matmul operands, f32 accum + f32 LN
    print("KERNEL_OK")
</pallas_src>

<mosaic_0001>
module attributes {stable_mosaic.version = 11 : i64} {
  func.func @_blockwise_embed_kernel(%arg0: i32, %arg1: i32, %arg2: memref<2x1x16x32xf32, #tpu.memory_space<vmem>>, %arg3: memref<1x32x128xbf16, #tpu.memory_space<vmem>>, %arg4: memref<1x1x128xf32, #tpu.memory_space<vmem>>, %arg5: memref<1x32xf32, #tpu.memory_space<vmem>>, %arg6: memref<1x32xf32, #tpu.memory_space<vmem>>, %arg7: memref<1x128xf32, #tpu.memory_space<vmem>>, %arg8: memref<1x128xf32, #tpu.memory_space<vmem>>, %arg9: memref<2x1x16x128xf32, #tpu.memory_space<vmem>>) attributes {dimension_semantics = [#tpu.dimension_semantics<parallel>, #tpu.dimension_semantics<parallel>], iteration_bounds = array<i64: 2, 1>, scalar_prefetch = 0 : i64, scratch_operands = 0 : i64, tpu.core_type = #tpu.core_type<tc>, window_params = [{transform_indices = @transform_0, window_bounds = array<i64: 2, 1, 16, 32>}, {transform_indices = @transform_1, window_bounds = array<i64: 1, 32, 128>}, {transform_indices = @transform_2, window_bounds = array<i64: 1, 1, 128>}, {pipeline_mode = #tpu.pipeline_mode<synchronous>, transform_indices = @transform_3, window_bounds = array<i64: 1, 32>}, {pipeline_mode = #tpu.pipeline_mode<synchronous>, transform_indices = @transform_4, window_bounds = array<i64: 1, 32>}, {pipeline_mode = #tpu.pipeline_mode<synchronous>, transform_indices = @transform_5, window_bounds = array<i64: 1, 128>}, {pipeline_mode = #tpu.pipeline_mode<synchronous>, transform_indices = @transform_6, window_bounds = array<i64: 1, 128>}, {transform_indices = @transform_7, window_bounds = array<i64: 2, 1, 16, 128>}]} {
    %c0 = arith.constant 0 : index
    %c0_0 = arith.constant 0 : index
    %c0_1 = arith.constant 0 : index
    %c0_2 = arith.constant 0 : index
    %0 = vector.load %arg2[%c0, %c0_0, %c0_1, %c0_2] : memref<2x1x16x32xf32, #tpu.memory_space<vmem>>, vector<2x1x16x32xf32>
    %1 = vector.shape_cast %0 : vector<2x1x16x32xf32> to vector<2x16x32xf32>
    %2 = vector.shape_cast %1 : vector<2x16x32xf32> to vector<32x32xf32>
    %cst = arith.constant dense<0.000000e+00> : vector<32xf32>
    %3 = vector.multi_reduction <add>, %2, %cst [1] : vector<32x32xf32> to vector<32xf32>
    %4 = vector.shape_cast %3 : vector<32xf32> to vector<32x1xf32>
    %cst_3 = arith.constant 3.200000e+01 : f32
    %5 = vector.broadcast %cst_3 : f32 to vector<32x1xf32>
    %6 = arith.divf %4, %5 : vector<32x1xf32>
    %7 = vector.broadcast %6 : vector<32x1xf32> to vector<32x32xf32>
    %8 = arith.subf %2, %7 : vector<32x32xf32>
    %9 = arith.mulf %8, %8 : vector<32x32xf32>
    %cst_4 = arith.constant dense<0.000000e+00> : vector<32xf32>
    %10 = vector.multi_reduction <add>, %9, %cst_4 [1] : vector<32x32xf32> to vector<32xf32>
    %11 = vector.shape_cast %10 : vector<32xf32> to vector<32x1xf32>
    %cst_5 = arith.constant 3.200000e+01 : f32
    %12 = vector.broadcast %cst_5 : f32 to vector<32x1xf32>
    %13 = arith.divf %11, %12 : vector<32x1xf32>
    %cst_6 = arith.constant 9.99999974E-6 : f32
    %14 = vector.broadcast %cst_6 : f32 to vector<32x1xf32>
    %15 = arith.addf %13, %14 : vector<32x1xf32>
    %16 = math.rsqrt %15 : vector<32x1xf32>
    %17 = vector.broadcast %16 : vector<32x1xf32> to vector<32x32xf32>
    %18 = arith.mulf %8, %17 : vector<32x32xf32>
    %c0_7 = arith.constant 0 : index
    %c0_8 = arith.constant 0 : index
    %19 = vector.load %arg5[%c0_7, %c0_8] : memref<1x32xf32, #tpu.memory_space<vmem>>, vector<1x32xf32>
    %20 = vector.broadcast %19 : vector<1x32xf32> to vector<32x32xf32>
    %21 = arith.mulf %18, %20 : vector<32x32xf32>
    %c0_9 = arith.constant 0 : index
    %c0_10 = arith.constant 0 : index
    %22 = vector.load %arg6[%c0_9, %c0_10] : memref<1x32xf32, #tpu.memory_space<vmem>>, vector<1x32xf32>
    %23 = vector.broadcast %22 : vector<1x32xf32> to vector<32x32xf32>
    %24 = arith.addf %21, %23 : vector<32x32xf32>
    %25 = arith.truncf %24 : vector<32x32xf32> to vector<32x32xbf16>
    %c0_11 = arith.constant 0 : index
    %c0_12 = arith.constant 0 : index
    %c0_13 = arith.constant 0 : index
    %26 = vector.load %arg3[%c0_11, %c0_12, %c0_13] : memref<1x32x128xbf16, #tpu.memory_space<vmem>>, vector<1x32x128xbf16>
    %27 = vector.shape_cast %26 : vector<1x32x128xbf16> to vector<32x128xbf16>
    %cst_14 = arith.constant dense<0.000000e+00> : vector<32x128xf32>
    %28 = tpu.matmul %25, %27, %cst_14 {dimension_numbers = #tpu.dot_dimension_numbers<[1], [0], [0], [1], [0, 0, 1, 1], [], []>} : vector<32x32xbf16>, vector<32x128xbf16>, vector<32x128xf32> -> vector<32x128xf32>
    %c0_15 = arith.constant 0 : index
    %c0_16 = arith.constant 0 : index
    %c0_17 = arith.constant 0 : index
    %29 = vector.load %arg4[%c0_15, %c0_16, %c0_17] : memref<1x1x128xf32, #tpu.memory_space<vmem>>, vector<1x1x128xf32>
    %30 = vector.shape_cast %29 : vector<1x1x128xf32> to vector<1x128xf32>
    %31 = vector.broadcast %30 : vector<1x128xf32> to vector<32x128xf32>
    %32 = arith.addf %28, %31 : vector<32x128xf32>
    %cst_18 = arith.constant dense<0.000000e+00> : vector<32xf32>
    %33 = vector.multi_reduction <add>, %32, %cst_18 [1] : vector<32x128xf32> to vector<32xf32>
    %34 = vector.shape_cast %33 : vector<32xf32> to vector<32x1xf32>
    %cst_19 = arith.constant 3.125000e-02 : f32
    %35 = vector.broadcast %cst_19 : f32 to vector<32x1xf32>
    %36 = arith.mulf %34, %35 : vector<32x1xf32>
    %37 = vector.broadcast %36 : vector<32x1xf32> to vector<32x128xf32>
    %38 = arith.subf %32, %37 : vector<32x128xf32>
    %39 = tpu.iota {dimensions = array<i32: 1>} : vector<1x128xi32>
    %c32_i32 = arith.constant 32 : i32
    %40 = vector.broadcast %c32_i32 : i32 to vector<1x128xi32>
    %41 = arith.cmpi slt, %39, %40 : vector<1x128xi32>
    %42 = arith.extui %41 : vector<1x128xi1> to vector<1x128xi32>
    %43 = arith.sitofp %42 : vector<1x128xi32> to vector<1x128xf32>
    %44 = vector.broadcast %43 : vector<1x128xf32> to vector<32x128xf32>
    %45 = arith.mulf %38, %44 : vector<32x128xf32>
    %46 = arith.mulf %45, %45 : vector<32x128xf32>
    %cst_20 = arith.constant dense<0.000000e+00> : vector<32xf32>
    %47 = vector.multi_reduction <add>, %46, %cst_20 [1] : vector<32x128xf32> to vector<32xf32>
    %48 = vector.shape_cast %47 : vector<32xf32> to vector<32x1xf32>
    %cst_21 = arith.constant 3.125000e-02 : f32
    %49 = vector.broadcast %cst_21 : f32 to vector<32x1xf32>
    %50 = arith.mulf %48, %49 : vector<32x1xf32>
    %cst_22 = arith.constant 9.99999974E-6 : f32
    %51 = vector.broadcast %cst_22 : f32 to vector<32x1xf32>
    %52 = arith.addf %50, %51 : vector<32x1xf32>
    %53 = math.rsqrt %52 : vector<32x1xf32>
    %54 = vector.broadcast %53 : vector<32x1xf32> to vector<32x128xf32>
    %55 = arith.mulf %45, %54 : vector<32x128xf32>
    %c0_23 = arith.constant 0 : index
    %c0_24 = arith.constant 0 : index
    %56 = vector.load %arg7[%c0_23, %c0_24] : memref<1x128xf32, #tpu.memory_space<vmem>>, vector<1x128xf32>
    %57 = vector.broadcast %56 : vector<1x128xf32> to vector<32x128xf32>
    %58 = arith.mulf %55, %57 : vector<32x128xf32>
    %c0_25 = arith.constant 0 : index
    %c0_26 = arith.constant 0 : index
    %59 = vector.load %arg8[%c0_25, %c0_26] : memref<1x128xf32, #tpu.memory_space<vmem>>, vector<1x128xf32>
    %60 = vector.broadcast %59 : vector<1x128xf32> to vector<32x128xf32>
    %61 = arith.addf %58, %60 : vector<32x128xf32>
    %62 = vector.shape_cast %61 : vector<32x128xf32> to vector<2x16x128xf32>
    %c0_27 = arith.constant 0 : index
    %c0_28 = arith.constant 0 : index
    %c0_29 = arith.constant 0 : index
    %c0_30 = arith.constant 0 : index
    %63 = vector.load %arg9[%c0_27, %c0_28, %c0_29, %c0_30] : memref<2x1x16x128xf32, #tpu.memory_space<vmem>>, vector<2x1x16x128xf32>
    %64 = vector.shape_cast %63 : vector<2x1x16x128xf32> to vector<2x16x128xf32>
    %65 = vector.shape_cast %62 : vector<2x16x128xf32> to vector<2x1x16x128xf32>
    tpu.vector_store %arg9[%c0_27, %c0_28, %c0_29, %c0_30], %65 {strides = array<i32>} : memref<2x1x16x128xf32, #tpu.memory_space<vmem>>, vector<2x1x16x128xf32>,
    return
  }
  func.func @transform_0(%arg0: i32, %arg1: i32) -> (i32, i32, i32, i32) {
    %c0_i32 = arith.constant 0 : i32
    %c0_i32_0 = arith.constant 0 : i32
    %c0_i32_1 = arith.constant 0 : i32
    return %arg1, %arg0, %c0_i32, %c0_i32_0 : i32, i32, i32, i32
  }
  func.func @transform_1(%arg0: i32, %arg1: i32) -> (i32, i32, i32) {
    %c0_i32 = arith.constant 0 : i32
    %c0_i32_0 = arith.constant 0 : i32
    %c0_i32_1 = arith.constant 0 : i32
    return %arg0, %c0_i32, %c0_i32_0 : i32, i32, i32
  }
  func.func @transform_2(%arg0: i32, %arg1: i32) -> (i32, i32, i32) {
    %c0_i32 = arith.constant 0 : i32
    %c0_i32_0 = arith.constant 0 : i32
    %c0_i32_1 = arith.constant 0 : i32
    return %arg0, %c0_i32, %c0_i32_0 : i32, i32, i32
  }
  func.func @transform_3(%arg0: i32, %arg1: i32) -> (i32, i32) {
    %c0_i32 = arith.constant 0 : i32
    %c0_i32_0 = arith.constant 0 : i32
    %c0_i32_1 = arith.constant 0 : i32
    return %c0_i32, %c0_i32_0 : i32, i32
  }
  func.func @transform_4(%arg0: i32, %arg1: i32) -> (i32, i32) {
    %c0_i32 = arith.constant 0 : i32
    %c0_i32_0 = arith.constant 0 : i32
    %c0_i32_1 = arith.constant 0 : i32
    return %c0_i32, %c0_i32_0 : i32, i32
  }
  func.func @transform_5(%arg0: i32, %arg1: i32) -> (i32, i32) {
    %c0_i32 = arith.constant 0 : i32
    %c0_i32_0 = arith.constant 0 : i32
    %c0_i32_1 = arith.constant 0 : i32
    return %c0_i32, %c0_i32_0 : i32, i32
  }
  func.func @transform_6(%arg0: i32, %arg1: i32) -> (i32, i32) {
    %c0_i32 = arith.constant 0 : i32
    %c0_i32_0 = arith.constant 0 : i32
    %c0_i32_1 = arith.constant 0 : i32
    return %c0_i32, %c0_i32_0 : i32, i32
  }
  func.func @transform_7(%arg0: i32, %arg1: i32) -> (i32, i32, i32, i32) {
    %c0_i32 = arith.constant 0 : i32
    %c0_i32_0 = arith.constant 0 : i32
    %c0_i32_1 = arith.constant 0 : i32
    return %arg1, %arg0, %c0_i32, %c0_i32_0 : i32, i32, i32, i32
  }
}

</mosaic_0001>

<bundles_post_ra>
// kernel: tpu_custom_call.1
= control target key start
LH: loop header
LB: loop body
LE: loop exit
PB: predicated region body
PF: predicated region fallthrough
CT: control target
= control target key end

     0   :  { %s1420_s0 = inlined_call_operand.hbm [shape: f32[2,2,16,32], index: 0, kind: input, shape index: {}]   ;;  %s1421_s1 = inlined_call_operand.hbm [shape: bf16[2,32,128], index: 1, kind: input, shape index: {}]   ;;  %s1422_s2 = inlined_call_operand.hbm [shape: f32[2,1,128], index: 2, kind: input, shape index: {}]   ;;  %s1423_s3 = inlined_call_operand.vmem [shape: f32[1,32], index: 3, kind: input, shape index: {}]   ;;  %s1424_s4 = inlined_call_operand.vmem [shape: f32[1,32], index: 4, kind: input, shape index: {}]   ;;  %s1425_s5 = inlined_call_operand.vmem [shape: f32[1,128], index: 5, kind: input, shape index: {}]   ;;  %s1426_s6 = inlined_call_operand.vmem [shape: f32[1,128], index: 6, kind: input, shape index: {}]   ;;  %s1427_s7 = inlined_call_operand.hbm [shape: f32[2,2,16,128], index: 7, kind: output, shape index: {}]  }
   0x1   :  { %1435 = sst [smem:[#allocation24_spill]] %s1420_s0 }
   0x2   :  { %1436 = sst [smem:[#allocation25_spill]] %s1427_s7 }
   0x3   :  { %12 = vsyncpa [#allocation3], 0 }
   0x4   :  { %14 = vsyncpa [#allocation3 + $0x1], 0 }
   0x5   :  { %15 = vsyncpa [#allocation6], 0 }
   0x6   :  { %17 = vsyncpa [#allocation6 + $0x1], 0 }
   0x7   :  { %18 = vsyncpa [#allocation4], 0 }
   0x8   :  { %20 = vsyncpa [#allocation4 + $0x1], 0  ;;  %s1186_s24 = smov 0   ;;  %s1188_s25 = smov 0  }
   0x9   :  { %s1190_s26 = smov 0   ;;  %s1192_s27 = smov 0  }
   0xa   :  { %s1194_s28 = smov 0   ;;  %s1196_s29 = smov 0  }
   0xb LB: > { %1437 = sst [smem:[#allocation17_spill]] %s1107_s24  ;;  %s1217_s30 = sadd.s32 4294967295, %s1127_s29   ;;  %s1127_s29 = sphi %s1196_s29, %s26_s29   ;;  %s1123_s28 = sphi %s1194_s28, %s1461_s28   ;;  %s1119_s27 = sphi %s1192_s27, %s1460_s27   ;;  %s1115_s26 = sphi %s1190_s26, %s1456_s26   ;;  %s1111_s25 = sphi %s1188_s25, %s1459_s25   ;;  %s1107_s24 = sphi %s1186_s24, %s1458_s24  }
   0xc   : > { %1438 = sst [smem:[#allocation18_spill]] %s1115_s26  ;;  %s861_s8 = sadd.s32 4294967294, %s1127_s29  }
   0xd   : > { %1439 = sst [smem:[#allocation19_spill]] %s1119_s27  ;;  %s38_s9 = sadd.s32 1, %s1123_s28 }
   0xe   : > { %s47_s10 = sadd.s32 1, %s1115_s26  ;;  %p40_p0 = scmp.ge.s32.totalorder %s38_s9, 2 }
   0xf   : > { %p54_p1 = scmp.ne.s32.totalorder %s1115_s26, %s1111_s25  ;;  %p55_p2 = scmp.eq.s32.totalorder %s1127_s29, 0 }
  0x10   : > { %p60_p3 = scmp.ne.s32.totalorder %s1111_s25, %s1107_s24  ;;  %s1463_s9 = smov (%p40_p0, %s38_s9), 0 }
  0x11   : > { %1440 = sst [smem:[#allocation20_spill]] %s1463_s9  ;;  %p1229_p4 = por %p55_p2, %p54_p1 }
  0x12   : > { %p61_p5 = scmp.eq.s32.totalorder %s1217_s30, 0  ;;  %s43_s12 = ssub.s32 %s1123_s28, %s1463_s9 }
  0x13   : > { %p222_p6 = scmp.eq.s32.totalorder %s1217_s30, 1  ;;  %p45_p7 = scmp.eq.s32.totalorder %s43_s12, 0 }
  0x14   : > { %p1237_p8 = por %p61_p5, %p60_p3  ;;  %p228_p10 = scmp.eq.s32.totalorder %s861_s8, 1 }
  0x15   : > { %p1241_p9 = por %p222_p6, %p54_p1  ;;  %p863_p12 = scmp.ge.s32.totalorder %s1127_s29, 2 }
  0x16   : > { %s1246_s15 = scalar_select %p45_p7, %s1115_s26, %s47_s10  }
  0x17   : > { %s1443_s14 = scalar_select %p1241_p9, 1, 0 }
  0x18   : > { %1445 = sst [smem:[#allocation22_spill]] %s1246_s15  ;;  %p1248_p11 = por %p228_p10, %p60_p3 }
  0x19   : > { %1444 = sst [smem:[#allocation21_spill]] %s1443_s14  ;;  %256 = sbr.rel (%p863_p12) target bundleno = 53 (0x35), region = 32 }
  0x1a   : > { %s1446_s16 = scalar_select %p1248_p11, 1, 0 }
  0x1c   : > { %1447 = sst [smem:[#allocation23_spill]] %s1446_s16 }
  0x1e   : > { %s1256_s17 = sand.u32 1, %s1115_s26   ;;  %s1430_s18 = sshll.u32 %s1123_s28, 4 }
  0x1f   : > { %s864_s19 = sshll.u32 %s1256_s17, 5  ;;  %s1448_s0 = sld [smem:[#allocation24_spill]] }
  0x20   : > { %s899_s23 = scalar_select %p1229_p4, [#allocation0], [#allocation13] }
  0x21   : > { %s264_s10 = scalar_lea.vmem [#allocation2], %s864_s19  ;;  %s1129_s15 = smov 512  }
  0x22   : > { %s287_s12 = sshll.u32 %s264_s10, 4  ;;  %s277_s9 = sld [smem:[%s899_s23]]   ;;  %s288_s12 = int_to_ptr.vmem [resolvable:$true] %s287_s12 }
  0x23   : > { %900 = sst [smem:[#allocation10]] (%p1229_p4), %s1129_s15  ;;  %s1130_s26 = smov 256  }
  0x24   : > { %901 = sst [smem:[#allocation10 + $0x1]] (%p1229_p4), %s1130_s26  ;;  %s1131_s20 = smov 2  }
  0x25   : > { %s272_s22 = scalar_lea.hbm %s1448_s0, %s1430_s18  ;;  %902 = sst [smem:[#allocation10 + $0x2]] (%p1229_p4), %s1131_s20 }
  0x26   : > { %s285_s8 = sshll.u32 %s272_s22, 4  ;;  %s1132_s21 = smov 128   ;;  %s286_s8 = int_to_ptr.hbm [resolvable:$true] %s285_s8 }
  0x27   : > { %903 = sst [smem:[#allocation10 + $0x3]] (%p1229_p4), %s1132_s21  ;;  %s1133_s23 = smov 8  }
  0x28   : > { %s867_s19 = sshll.u32 %s277_s9, 26  ;;  %904 = sst [smem:[#allocation10 + $0x4]] (%p1229_p4), %s1132_s21 }
  0x29   : > { %s868_s22 = sadd.s32 134217728, %s867_s19  ;;  %905 = sst [smem:[#allocation10 + $0x5]] (%p1229_p4), %s1133_s23 }
  0x2a   : > { %s261_s10 = scalar_lea.sflag [#allocation3], %s1256_s17  ;;  %s1134_s18 = smov [#allocation9]  }
  0x2b   : > { %906 = dma.general (%p1229_p4), %s286_s8, 512, %s288_s12, %s261_s10, %s1134_s18, [#allocation10], %s868_s22, 0  }
  0x2c   : > { %s310_s26 = sand.u32 1, %s1127_s29   ;;  %s869_s15 = sshll.u32 %s1256_s17, 4 }
  0x2d   : > { %s1449_s20 = sshll.u32 %s1123_s28, 4  ;;  %s314_s19 = scalar_lea.vmem [#allocation5], %s869_s15 }
  0x2e   : > { %s319_s21 = scalar_lea.hbm %s1421_s1, %s1449_s20  ;;  %s322_s23 = sshll.u32 %s314_s19, 4  ;;  %s323_s23 = int_to_ptr.vmem [resolvable:$true] %s322_s23 }
  0x2f   : > { %s320_s16 = sshll.u32 %s319_s21, 4  ;;  %s311_s18 = scalar_lea.sflag [#allocation6], %s310_s26  ;;  %s321_s16 = int_to_ptr.hbm [resolvable:$true] %s320_s16 }
  0x30   : > { %s1135_s8 = smov 64   ;;  %s1136_s12 = smov 4  }
  0x31   : > { %907 = dma.hbm_to_vmem [thread:$0]  (%p1229_p4), %s321_s16, 256, %s323_s23, %s311_s18, %s1135_s8, %s1135_s8, %s1136_s12  }
  0x32   : > { %s338_s24 = scalar_lea.hbm %s1422_s2, %s1123_s28  ;;  %s335_s7 = scalar_lea.vmem [#allocation7], %s1256_s17 }
  0x33   : > { %s342_s14 = sshll.u32 %s335_s7, 4  ;;  %s340_s27 = sshll.u32 %s338_s24, 4  ;;  %s343_s14 = int_to_ptr.vmem [resolvable:$true] %s342_s14  ;;  %s341_s27 = int_to_ptr.hbm [resolvable:$true] %s340_s27 }
  0x34   : > { %908 = dma.hbm_to_vmem [thread:$0]  (%p1229_p4), %s341_s27, 16, %s343_s14, %s311_s18  }
  0x35 PF: > { %p872_p13 = scmp.ge.s32.totalorder %s1127_s29, 1  ;;  %p347_p0 = scmp.lt.s32.totalorder %s1127_s29, 3 }
  0x37   : > { %p348_p1 = pnand %p872_p13, %p347_p0 }
  0x38   : > { %s1301_s0 = sand.u32 (!%p348_p1), 1, %s1111_s25  }
  0x39   : > { %351 = sbr.rel (%p348_p1) target bundleno = 763 (0x2fb), region = 48  ;;  %s873_s7 = sshll.u32 (!%p348_p1), %s1301_s0, 5 }
  0x3a   : > { %s354_s24 = scalar_lea.sflag (!%p348_p1), [#allocation3], %s1301_s0  ;;  %s357_s16 = scalar_lea.vmem (!%p348_p1), [#allocation2], %s873_s7 }
  0x3e   : > { %1094 = dma.done.wait (%p1237_p8), %s354_s24, 512  }
  0x3f   : > { %1096 = vsyncadd (%p1237_p8), %s354_s24, 4294966784  ;;  %s363_s27 = sand.u32 1, %s1217_s30   ;;  %s874_s11 = sshll.u32 %s1301_s0, 4 }
  0x40   : > { %s364_s14 = scalar_lea.sflag [#allocation6], %s363_s27  ;;  %s1313_s17 = scalar_lea.vmem [#allocation5], %s874_s11 }
  0x41   : > { %1098 = dma.done.wait (%p1237_p8), %s364_s14, 272  }
  0x42   : > { %1100 = vsyncadd (%p1237_p8), %s364_s14, 4294967024  ;;  %vm424_vm0 = vcmask 261120   ;;  %v422_v0 = vld [vmem:[%s357_s16 + $0x10] sm:$0xff]  ;;  %v420_v1 = vld [vmem:[%s357_s16] sm:$0xff]  ;;  %v1137_v8 = vmov 32.0   ;;  %s376_s30 = scalar_lea.vmem [#allocation7], %s1301_s0 }
  0x43   : > { %v431_v2 = vsel %vm424_vm0, %v422_v0, 0.0  ;;  %v425_v3 = vsel %vm424_vm0, %v420_v1, 0.0  ;;  %v423_v4 = vld [vmem:[%s357_s16 + $0x18] sm:$0xff]  ;;  %v421_v5 = vld [vmem:[%s357_s16 + $0x8] sm:$0xff]  ;;  %995 = vrcp.f32 %v1137_v8  ;;  %v894_v40 = vld [vmem:[%s1313_s17] sm:$0xff]  ;;  %s416_s18 = scalar_lea.vmem [#allocation8], %s873_s7 }
  0x44   : > { %432 = vadd.xlane.f32.xlu1 %v431_v2  ;;  %426 = vadd.xlane.f32.xlu0 %v425_v3  ;;  %v434_v6 = vsel %vm424_vm0, %v423_v4, 0.0  ;;  %v428_v7 = vsel %vm424_vm0, %v421_v5, 0.0  ;;  %v895_v35 = vld [vmem:[%s1313_s17 + $0x8] sm:$0xff]  ;;  %s693_s8 = scalar_lea.sflag [#allocation4], %s1301_s0 }
  0x45   : > { %570 = vmatpush.bf16.msra.mxu0 %v895_v35  ;;  %897 = vmatpush.bf16.msra.mxu1 %v895_v35 }
  0x49   : > { %v996_v9 = vpop.eup %995  ;;  %571 = vmatpush.bf16.msra.mxu0 %v894_v40  ;;  %898 = vmatpush.bf16.msra.mxu1 %v894_v40 }
  0x4a   : > { %v438_v10 = vmul.f32 32.0, %v996_v9  ;;  %vm442_vm1 = vweird.f32 %v996_v9 }
  0x4c   : > { %435 = vadd.xlane.f32.xlu1 %v434_v6  ;;  %429 = vadd.xlane.f32.xlu0 %v428_v7  ;;  %v439_v11 = vsub.f32 1.0, %v438_v10  ;;  %v990_v10 = vld [vmem:[%s1423_s3] ss:$0 sm:$0xff] }
  0x4e   : > { %v440_v12 = vmul.f32 %v996_v9, %v439_v11 }
  0x50   : > { %v441_v13 = vadd.f32 %v996_v9, %v440_v12 }
  0x52   : > { %v443_v14 = vsel %vm442_vm1, %v996_v9, %v441_v13 }
  0xb7   : > { %v433_v15 = vpop.xlane.xlu1 %432  ;;  %v427_v16 = vpop.xlane.xlu0 %426 }
  0xb8   : > { %v446_v17 = vmul.f32 %v443_v14, %v433_v15  ;;  %v444_v18 = vmul.f32 %v443_v14, %v427_v16 }
  0xba   : > { %v1323_v19 = vsub.f32 %v422_v0, %v446_v17  ;;  %v1325_v20 = vsub.f32 %v420_v1, %v444_v18  ;;  %v991_v17 = vld [vmem:[%s1424_s4] ss:$0 sm:$0xff] }
  0xbc   : > { %v454_v21 = vmul.f32 %v1323_v19, %v1323_v19  ;;  %v452_v22 = vmul.f32 %v1325_v20, %v1325_v20 }
  0xbe   : > { %v462_v23 = vsel %vm424_vm0, %v454_v21, 0.0  ;;  %v456_v24 = vsel %vm424_vm0, %v452_v22, 0.0 }
  0xbf   : > { %v436_v25 = vpop.xlane.xlu1 %435  ;;  %463 = vadd.xlane.f32.xlu0 %v462_v23  ;;  %457 = vadd.xlane.f32.xlu2 %v456_v24  ;;  %v430_v26 = vpop.xlane.xlu0 %429 }
  0xc0   : > { %v447_v27 = vmul.f32 %v443_v14, %v436_v25  ;;  %v445_v28 = vmul.f32 %v443_v14, %v430_v26 }
  0xc2   : > { %v1333_v29 = vsub.f32 %v423_v4, %v447_v27  ;;  %v1335_v30 = vsub.f32 %v421_v5, %v445_v28 }
  0xc4   : > { %v455_v31 = vmul.f32 %v1333_v29, %v1333_v29  ;;  %v453_v32 = vmul.f32 %v1335_v30, %v1335_v30 }
  0xc6   : > { %v465_v33 = vsel %vm424_vm0, %v455_v31, 0.0  ;;  %v459_v34 = vsel %vm424_vm0, %v453_v32, 0.0 }
  0xc7   : > { %466 = vadd.xlane.f32.xlu1 %v465_v33  ;;  %460 = vadd.xlane.f32.xlu2 %v459_v34 }
 0x132   : > { %v458_v36 = vpop.xlane.xlu2 %457  ;;  %v464_v37 = vpop.xlane.xlu0 %463 }
 0x133   : > { %v468_v38 = vmul.f32 %v458_v36, %v443_v14  ;;  %v470_v39 = vmul.f32 %v464_v37, %v443_v14 }
 0x135   : > { %v472_v41 = vadd.f32 1e-05, %v468_v38  ;;  %v474_v42 = vadd.f32 1e-05, %v470_v39  ;;  %v599_v38 = vlaneseq }
 0x137   : > { %997 = vrsqrt.f32 %v472_v41  ;;  %vm502_vm4 = vweird.f32 %v474_v42  ;;  %vm482_vm5 = vweird.f32 %v472_v41  ;;  %v600_v39 = vand.u32 127, %v599_v38 }
 0x138   : > { %999 = vrsqrt.f32 %v474_v42 }
 0x139   : > { %vm601_vm14 = vcmp.lt.s32.totalorder %v600_v39, 32 }
 0x13a   : > { %v467_v43 = vpop.xlane.xlu1 %466  ;;  %v461_v44 = vpop.xlane.xlu2 %460 }
 0x13b   : > { %v471_v45 = vmul.f32 %v467_v43, %v443_v14  ;;  %v469_v46 = vmul.f32 %v461_v44, %v443_v14  ;;  %v1138_v44 = vmov 0.0  }
 0x13d   : > { %v998_v47 = vpop.eup %997  ;;  %v475_v48 = vadd.f32 1e-05, %v471_v45  ;;  %v473_v49 = vadd.f32 1e-05, %v469_v46  ;;  %v886_v45 = vsel %vm601_vm14, 1.0, %v1138_v44 }
 0x13e   : > { %v1000_v50 = vpop.eup %999  ;;  %v477_v51 = vmul.f32 %v998_v47, %v472_v41  ;;  %vm483_vm3 = vweird.f32 %v998_v47 }
 0x13f   : > { %v497_v52 = vmul.f32 %v1000_v50, %v474_v42  ;;  %1001 = vrsqrt.f32 %v475_v48  ;;  %vm503_vm2 = vweird.f32 %v1000_v50  ;;  %vm484_vm7 = vmor %vm482_vm5, %vm483_vm3  ;;  %vm512_vm10 = vweird.f32 %v475_v48 }
 0x140   : > { %v478_v53 = vmul.f32 %v998_v47, %v477_v51  ;;  %1003 = vrsqrt.f32 %v473_v49  ;;  %vm504_vm6 = vmor %vm502_vm4, %vm503_vm2  ;;  %vm492_vm12 = vweird.f32 %v473_v49 }
 0x141   : > { %v498_v54 = vmul.f32 %v1000_v50, %v497_v52 }
 0x142   : > { %v479_v55 = vmul.f32 0.5, %v478_v53 }
 0x143   : > { %v499_v56 = vmul.f32 0.5, %v498_v54 }
 0x144   : > { %v480_v57 = vsub.f32 1.5, %v479_v55 }
 0x145   : > { %v1002_v58 = vpop.eup %1001  ;;  %v500_v59 = vsub.f32 1.5, %v499_v56 }
 0x146   : > { %v1004_v60 = vpop.eup %1003  ;;  %v507_v61 = vmul.f32 %v1002_v58, %v475_v48  ;;  %v481_v62 = vmul.f32 %v998_v47, %v480_v57  ;;  %vm513_vm8 = vweird.f32 %v1002_v58 }
 0x147   : > { %v501_v63 = vmul.f32 %v1000_v50, %v500_v59  ;;  %v487_v0 = vmul.f32 %v1004_v60, %v473_v49  ;;  %vm493_vm9 = vweird.f32 %v1004_v60  ;;  %vm514_vm11 = vmor %vm512_vm10, %vm513_vm8 }
 0x148   : > { %v508_v1 = vmul.f32 %v1002_v58, %v507_v61  ;;  %v485_v5 = vsel %vm484_vm7, %v998_v47, %v481_v62  ;;  %vm494_vm13 = vmor %vm492_vm12, %vm493_vm9 }
 0x149   : > { %v488_v2 = vmul.f32 %v1004_v60, %v487_v0  ;;  %v505_v3 = vsel %vm504_vm6, %v1000_v50, %v501_v63  ;;  %v516_v11 = vmul.f32 %v485_v5, %v1325_v20 }
 0x14a   : > { %v509_v4 = vmul.f32 0.5, %v508_v1  ;;  %v518_v8 = vmul.f32 %v505_v3, %v1323_v19 }
 0x14b   : > { %v489_v6 = vmul.f32 0.5, %v488_v2  ;;  %v524_v21 = vmul.f32 %v990_v10, %v516_v11 }
 0x14c   : > { %v510_v7 = vsub.f32 1.5, %v509_v4  ;;  %v526_v18 = vmul.f32 %v990_v10, %v518_v8 }
 0x14d   : > { %v490_v9 = vsub.f32 1.5, %v489_v6  ;;  %v532_v25 = vadd.f32 %v991_v17, %v524_v21 }
 0x14e   : > { %v511_v12 = vmul.f32 %v1002_v58, %v510_v7  ;;  %v534_v23 = vadd.f32 %v991_v17, %v526_v18 }
 0x14f   : > { %v491_v13 = vmul.f32 %v1004_v60, %v490_v9 }
 0x150   : > { %v515_v14 = vsel %vm514_vm11, %v1002_v58, %v511_v12 }
 0x151   : > { %v519_v15 = vmul.f32 %v515_v14, %v1333_v29  ;;  %v495_v16 = vsel %vm494_vm13, %v1004_v60, %v491_v13  ;;  %v992_v29 = vld [vmem:[%s376_s30] ss:$0 sm:$0xff] }
 0x152   : > { %v517_v19 = vmul.f32 %v495_v16, %v1335_v30 }
 0x153   : > { %v527_v20 = vmul.f32 %v990_v10, %v519_v15 }
 0x154   : > { %v525_v22 = vmul.f32 %v990_v10, %v517_v19 }
 0x155   : > { %v535_v24 = vadd.f32 %v991_v17, %v527_v20 }
 0x156   : > { %v533_v26 = vadd.f32 %v991_v17, %v525_v22 }
 0x157   : > { %v537_v27 = vpack.c.bf16 %v535_v24, %v534_v23  ;;  %v993_v23 = vld [vmem:[%s1425_s5] ss:$0 sm:$0xff] }
 0x158   : > { %v536_v28 = vpack.c.bf16 %v533_v26, %v532_v25 }
 0x159   : > { %885 = vmatmul.msk.bf16.vlgmr.msra.gmra.mxu1 %vm424_vm0, %v537_v27 }
 0x15a   : > { %884 = vmatmul.msk.bf16.vlgmr.msra.gmra.mxu0 %vm424_vm0, %v536_v28  ;;  %v994_v28 = vld [vmem:[%s1426_s6] ss:$0 sm:$0xff] }
 0x1d6   : > { %v578_v31 = vpop.f32.mrf.mxu1 }
 0x1d7   : > { %v573_v32 = vpop.f32.mrf.mxu0  ;;  %v579_v33 = vadd.f32 %v992_v29, %v578_v31 }
 0x1d8   : > { %v574_v34 = vadd.f32 %v992_v29, %v573_v32 }
 0x1d9   : > { %587 = vadd.xlane.f32.xlu1 %v579_v33 }
 0x1da   : > { %583 = vadd.xlane.f32.xlu2 %v574_v34 }
 0x1de   : > { %v580_v30 = vpop.f32.mrf.mxu1 }
 0x1df   : > { %v575_v35 = vpop.f32.mrf.mxu0  ;;  %v581_v36 = vadd.f32 %v992_v29, %v580_v30 }
 0x1e0   : > { %v576_v37 = vadd.f32 %v992_v29, %v575_v35 }
 0x1e2   : > { %585 = vadd.xlane.f32.xlu0 %v576_v37  ;;  %589 = vadd.xlane.f32.xlu2 %v581_v36 }
 0x24c   : > { %v588_v40 = vpop.xlane.xlu1 %587 }
 0x24d   : > { %v584_v41 = vpop.xlane.xlu2 %583  ;;  %v593_v42 = vmul.f32 0.03125, %v588_v40 }
 0x24e   : > { %v591_v43 = vmul.f32 0.03125, %v584_v41 }
 0x24f   : > { %v597_v46 = vsub.f32 %v579_v33, %v593_v42 }
 0x250   : > { %v595_v47 = vsub.f32 %v574_v34, %v591_v43 }
 0x251   : > { %v606_v48 = vmul.f32 %v886_v45, %v597_v46 }
 0x252   : > { %v604_v49 = vmul.f32 %v886_v45, %v595_v47 }
 0x253   : > { %v610_v50 = vmul.f32 %v606_v48, %v606_v48 }
 0x254   : > { %v608_v51 = vmul.f32 %v604_v49, %v604_v49 }
 0x255   : > { %v590_v52 = vpop.xlane.xlu2 %589  ;;  %v586_v53 = vpop.xlane.xlu0 %585  ;;  %616 = vadd.xlane.f32.xlu2 %v610_v50 }
 0x256   : > { %v594_v54 = vmul.f32 0.03125, %v590_v52  ;;  %v592_v55 = vmul.f32 0.03125, %v586_v53  ;;  %612 = vadd.xlane.f32.xlu0 %v608_v51 }
 0x258   : > { %v598_v56 = vsub.f32 %v581_v36, %v594_v54  ;;  %v596_v57 = vsub.f32 %v576_v37, %v592_v55 }
 0x25a   : > { %v1360_v58 = vmul.f32 %v886_v45, %v598_v56  ;;  %v1362_v59 = vmul.f32 %v886_v45, %v596_v57 }
 0x25c   : > { %v611_v60 = vmul.f32 %v1360_v58, %v1360_v58  ;;  %v609_v61 = vmul.f32 %v1362_v59, %v1362_v59 }
 0x25e   : > { %618 = vadd.xlane.f32.xlu0 %v611_v60  ;;  %614 = vadd.xlane.f32.xlu1 %v609_v61 }
 0x2c8   : > { %v617_v62 = vpop.xlane.xlu2 %616 }
 0x2c9   : > { %v622_v63 = vmul.f32 0.03125, %v617_v62  ;;  %v613_v0 = vpop.xlane.xlu0 %612 }
 0x2ca   : > { %v620_v1 = vmul.f32 0.03125, %v613_v0 }
 0x2cb   : > { %v626_v2 = vadd.f32 1e-05, %v622_v63 }
 0x2cc   : > { %v624_v3 = vadd.f32 1e-05, %v620_v1 }
 0x2cd   : > { %1005 = vrsqrt.f32 %v626_v2  ;;  %vm654_vm1 = vweird.f32 %v626_v2 }
 0x2ce   : > { %1007 = vrsqrt.f32 %v624_v3  ;;  %vm634_vm3 = vweird.f32 %v624_v3 }
 0x2d1   : > { %v615_v4 = vpop.xlane.xlu1 %614  ;;  %v619_v5 = vpop.xlane.xlu0 %618 }
 0x2d2   : > { %v621_v6 = vmul.f32 0.03125, %v615_v4  ;;  %v623_v7 = vmul.f32 0.03125, %v619_v5 }
 0x2d3   : > { %v1006_v8 = vpop.eup %1005 }
 0x2d4   : > { %v1008_v9 = vpop.eup %1007  ;;  %v649_v10 = vmul.f32 %v1006_v8, %v626_v2  ;;  %v625_v11 = vadd.f32 1e-05, %v621_v6  ;;  %v627_v12 = vadd.f32 1e-05, %v623_v7  ;;  %vm655_vm15 = vweird.f32 %v1006_v8 }
 0x2d5   : > { %v629_v13 = vmul.f32 %v1008_v9, %v624_v3  ;;  %vm635_vm0 = vweird.f32 %v1008_v9  ;;  %vm656_vm2 = vmor %vm654_vm1, %vm655_vm15 }
 0x2d6   : > { %v650_v14 = vmul.f32 %v1006_v8, %v649_v10  ;;  %1009 = vrsqrt.f32 %v625_v11  ;;  %vm636_vm4 = vmor %vm634_vm3, %vm635_vm0  ;;  %vm644_vm7 = vweird.f32 %v625_v11  ;;  %vm664_vm9 = vweird.f32 %v627_v12 }
 0x2d7   : > { %v630_v15 = vmul.f32 %v1008_v9, %v629_v13  ;;  %1011 = vrsqrt.f32 %v627_v12 }
 0x2d8   : > { %v651_v16 = vmul.f32 0.5, %v650_v14 }
 0x2d9   : > { %v631_v17 = vmul.f32 0.5, %v630_v15 }
 0x2da   : > { %v652_v18 = vsub.f32 1.5, %v651_v16 }
 0x2db   : > { %v632_v19 = vsub.f32 1.5, %v631_v17 }
 0x2dc   : > { %v1010_v21 = vpop.eup %1009  ;;  %v653_v20 = vmul.f32 %v1006_v8, %v652_v18 }
 0x2dd   : > { %v1012_v22 = vpop.eup %1011  ;;  %v633_v24 = vmul.f32 %v1008_v9, %v632_v19  ;;  %v639_v25 = vmul.f32 %v1010_v21, %v625_v11  ;;  %vm645_vm5 = vweird.f32 %v1010_v21 }
 0x2de   : > { %v657_v26 = vsel %vm656_vm2, %v1006_v8, %v653_v20  ;;  %v659_v27 = vmul.f32 %v1012_v22, %v627_v12  ;;  %vm665_vm6 = vweird.f32 %v1012_v22  ;;  %vm646_vm8 = vmor %vm644_vm7, %vm645_vm5 }
 0x2df   : > { %v670_v29 = vmul.f32 %v657_v26, %v606_v48  ;;  %v637_v31 = vsel %vm636_vm4, %v1008_v9, %v633_v24  ;;  %v640_v32 = vmul.f32 %v1010_v21, %v639_v25  ;;  %vm666_vm10 = vmor %vm664_vm9, %vm665_vm6 }
 0x2e0   : > { %v668_v33 = vmul.f32 %v637_v31, %v604_v49  ;;  %v660_v34 = vmul.f32 %v1012_v22, %v659_v27 }
 0x2e1   : > { %v678_v30 = vmul.f32 %v993_v23, %v670_v29  ;;  %v641_v35 = vmul.f32 0.5, %v640_v32 }
 0x2e2   : > { %v676_v36 = vmul.f32 %v993_v23, %v668_v33  ;;  %v661_v37 = vmul.f32 0.5, %v660_v34 }
 0x2e3   : > { %v686_v38 = vadd.f32 %v994_v28, %v678_v30  ;;  %v642_v39 = vsub.f32 1.5, %v641_v35 }
 0x2e4   : > { %v684_v40 = vadd.f32 %v994_v28, %v676_v36  ;;  %v662_v41 = vsub.f32 1.5, %v661_v37 }
 0x2e5   : > { %690 = vst [vmem:[%s416_s18 + $0x10] sm:$0xff] %v686_v38  ;;  %v643_v42 = vmul.f32 %v1010_v21, %v642_v39 }
 0x2e6   : > { %688 = vst [vmem:[%s416_s18] sm:$0xff] %v684_v40  ;;  %v663_v43 = vmul.f32 %v1012_v22, %v662_v41 }
 0x2e7   : > { %v647_v44 = vsel %vm646_vm8, %v1010_v21, %v643_v42 }
 0x2e8   : > { %v669_v45 = vmul.f32 %v647_v44, %v1362_v59  ;;  %v667_v46 = vsel %vm666_vm10, %v1012_v22, %v663_v43 }
 0x2e9   : > { %v671_v47 = vmul.f32 %v667_v46, %v1360_v58 }
 0x2ea   : > { %v677_v48 = vmul.f32 %v993_v23, %v669_v45 }
 0x2eb   : > { %v679_v49 = vmul.f32 %v993_v23, %v671_v47 }
 0x2ec   : > { %v685_v50 = vadd.f32 %v994_v28, %v677_v48 }
 0x2ed   : > { %v687_v51 = vadd.f32 %v994_v28, %v679_v49 }
 0x2ee   : > { %689 = vst [vmem:[%s416_s18 + $0x8] sm:$0xff] %v685_v50 }
 0x2ef   : > { %691 = vst [vmem:[%s416_s18 + $0x18] sm:$0xff] %v687_v51 }
 0x2f0   : > { %s1450_s12 = sld [smem:[#allocation19_spill]]  ;;  %s718_s7 = sshll.u32 %s416_s18, 4  ;;  %s719_s7 = int_to_ptr.vmem [resolvable:$true] %s718_s7 }
 0x2f1   : > { %s1452_s27 = sld [smem:[#allocation25_spill]]  ;;  %s1139_s17 = smov 256  }
 0x2f2   : > { %912 = sst [smem:[#allocation12]] (%p1241_p9), %s1139_s17  ;;  %s1140_s0 = smov 512  }
 0x2f3   : > { %913 = sst [smem:[#allocation12 + $0x1]] (%p1241_p9), %s1140_s0  ;;  %s1141_s30 = smov 2  }
 0x2f4   : > { %914 = sst [smem:[#allocation12 + $0x2]] (%p1241_p9), %s1141_s30  ;;  %s1142_s13 = smov 128  }
 0x2f5   : > { %915 = sst [smem:[#allocation12 + $0x3]] (%p1241_p9), %s1142_s13  ;;  %s1143_s26 = smov 8  }
 0x2f6   : > { %s896_s10 = sshll.u32 %s1450_s12, 4  ;;  %916 = sst [smem:[#allocation12 + $0x4]] (%p1241_p9), %s1142_s13 }
 0x2f7   : > { %s707_s11 = scalar_lea.hbm %s1452_s27, %s896_s10  ;;  %917 = sst [smem:[#allocation12 + $0x5]] (%p1241_p9), %s1143_s26 }
 0x2f8   : > { %s720_s14 = sshll.u32 %s707_s11, 4  ;;  %s1144_s15 = smov [#allocation11]   ;;  %s721_s14 = int_to_ptr.hbm [resolvable:$true] %s720_s14 }
 0x2f9   : > { %s1145_s20 = smov 0  }
 0x2fa   : > { %918 = dma.general (%p1241_p9), %s719_s7, 512, %s721_s14, %s693_s8, %s1144_s15, [#allocation12], %s1145_s20, 0  }
 0x2fb PF: > { %s1453_s9 = sld [smem:[#allocation17_spill]]  ;;  %p921_p2 = pnand %p863_p12, %p1248_p11 }
 0x2fd   : > { %p922_p3 = pneg %p921_p2 }
 0x301   : > { %s748_s19 = sand.u32 1, %s1453_s9  }
 0x302   : > { %s749_s23 = scalar_lea.sflag [#allocation4], %s748_s19 }
 0x303   : > { %1102 = dma.done.wait (%p922_p3), %s749_s23, 512  }
 0x304   : > { %1104 = vsyncadd (%p922_p3), %s749_s23, 4294966784  ;;  %s26_s29 = sadd.s32 1, %s1127_s29   ;;  %s1455_s18 = sld [smem:[#allocation18_spill]] }
 0x305   : > { %p23_p4 = scmp.ge.s32.totalorder %s26_s29, 4   ;;  %s1456_s26 = sld [smem:[#allocation22_spill]] }
 0x306   : > { %s1457_s8 = sld [smem:[#allocation20_spill]]  ;;  %s1458_s24 = smov %s1111_s25 }
 0x307   : > { %s1460_s27 = smov %s1123_s28 }
 0x308   :  { %25 = sbr.rel (!%p23_p4) target bundleno = 11 (0xb), region = 127 }
 0x30a   : > { %s1459_s25 = smov %s1455_s18 }
 0x30c   : > { %s1461_s28 = smov %s1457_s8 }
 0x30d   :  { %755 = vsyncpa [#allocation3], 1 }
 0x30e   :  { %757 = vsyncpa [#allocation3 + $0x1], 1 }
 0x30f   :  { %758 = vsyncpa [#allocation6], 1 }
 0x310   :  { %760 = vsyncpa [#allocation6 + $0x1], 1 }
 0x311   :  { %761 = vsyncpa [#allocation4], 1 }
 0x312   :  { %763 = vsyncpa [#allocation4 + $0x1], 1 }

</bundles_post_ra>
